<compile_context>
chip_gen: v7x
topology: tpu7x:2x2x1
jax: 0.10.0
libtpu: 0.0.40
codegen_flags: <defaults>
</compile_context>

<pallas_src>
import functools
import math

import jax
import jax.numpy as jnp
from jax.experimental import pallas as pl
from jax.experimental.pallas import tpu as pltpu

LANE = 128  # TPU lane width


def _round_up(x: int, m: int) -> int:
    return ((x + m - 1) // m) * m


def _pick_tile(B: int, row_align: int) -> int:
    """Batch tile: big (up to 512 rows ~ 85% of HBM roofline in measured
    sweeps), but with >=2 grid steps when possible so both v7x TensorCores
    get a share of the 'parallel' batch axis."""
    if B <= row_align:
        return row_align
    half = _round_up(pl.cdiv(B, 2), row_align)
    return min(512, half)


def _fused_mlp_kernel(*refs, num_layers: int):
    """refs = (x, w0, b0, ..., w_{L-1}, b_{L-1}, out).

    Weights are bf16 (D_in, D_out) (pre-transposed, lane-padded, resident
    across grid steps); biases are f32 (1, D_out).  Sigmoid after every layer
    except the last (the PyTorch out_layer).  MXU operands are bf16, the
    accumulator / bias add / sigmoid stay f32 (v5e-safe).
    """
    x_ref, o_ref = refs[0], refs[-1]
    wb = refs[1:-1]

    h = x_ref[...].astype(jnp.bfloat16)          # MXU operand dtype
    for l in range(num_layers):
        w = wb[2 * l][...]                       # bf16 (d_in, d_out)
        b = wb[2 * l + 1][...]                   # f32  (1, d_out)
        acc = jnp.dot(h, w, preferred_element_type=jnp.float32) + b
        if l < num_layers - 1:
            acc = jax.nn.sigmoid(acc)            # f32 EUP transcendental
            h = acc.astype(jnp.bfloat16)
        else:
            h = acc                              # out_layer: no sigmoid
    o_ref[...] = h.astype(o_ref.dtype)


def fused_encoder_forward(x_flat, weights_t, biases, out_dim):
    """Run the whole MLP in one pallas_call.

    x_flat:    (B, D_in)
    weights_t: list of bf16 (d_in, d_out) arrays (pre-transposed, lane-padded)
    biases:    list of f32 (1, d_out) arrays (lane-padded)
    out_dim:   true (unpadded) output width to slice back to
    """
    B, D_in = x_flat.shape
    num_layers = len(weights_t)
    D_out = weights_t[-1].shape[1]               # lane-padded
    itemsize = x_flat.dtype.itemsize

    row_align = 16 if x_flat.dtype == jnp.bfloat16 else 8
    TB = _pick_tile(B, row_align)
    grid = pl.cdiv(B, TB)
    B_pad = grid * TB
    if B_pad != B:
        # Pad rows instead of falling back to a whole-array VMEM path.
        x_flat = jnp.pad(x_flat, ((0, B_pad - B), (0, 0)))

    kernel = functools.partial(_fused_mlp_kernel, num_layers=num_layers)

    wb_inputs = []
    in_specs = [pl.BlockSpec((TB, D_in), lambda i: (i, 0))]
    for w, b in zip(weights_t, biases):
        wb_inputs += [w, b]
        # Constant block index -> weights/biases stay resident across steps.
        in_specs.append(pl.BlockSpec(w.shape, lambda i: (0, 0)))
        in_specs.append(pl.BlockSpec(b.shape, lambda i: (0, 0)))

    w_bytes = sum(int(w.size) * w.dtype.itemsize for w in weights_t)
    b_bytes = sum(int(b.size) * b.dtype.itemsize for b in biases)
    flops = 2 * B_pad * sum(w.shape[0] * w.shape[1] for w in weights_t)
    transcendentals = B_pad * sum(w.shape[1] for w in weights_t[:-1])
    bytes_accessed = (B_pad * D_in * itemsize + w_bytes + b_bytes
                      + B_pad * D_out * itemsize)

    # 2x for double buffering of the streamed x / out tiles (+ headroom).
    vmem_est = (2 * TB * D_in * itemsize + 2 * TB * D_out * itemsize
                + 2 * (w_bytes + b_bytes))
    vmem_limit = int(min(32 * 2**20, max(8 * 2**20, 2 * vmem_est)))

    out = pl.pallas_call(
        kernel,
        out_shape=jax.ShapeDtypeStruct((B_pad, D_out), x_flat.dtype),
        grid=(grid,),
        in_specs=in_specs,
        out_specs=pl.BlockSpec((TB, D_out), lambda i: (i, 0)),
        compiler_params=pltpu.CompilerParams(
            dimension_semantics=("parallel",),
            vmem_limit_bytes=vmem_limit,
        ),
        cost_estimate=pl.CostEstimate(
            flops=flops,
            transcendentals=transcendentals,
            bytes_accessed=bytes_accessed,
        ),
    )(x_flat, *wb_inputs)

    return out[:B, :out_dim]


def init_linear_params(key, in_features, out_features, w_dtype=jnp.bfloat16):
    """nn.Linear-style uniform(-1/sqrt(in), 1/sqrt(in)) init.

    Returns the weight already transposed to (in_features, out_features)
    (PyTorch stores (out, in) and computes x @ W^T) and cast to bf16 for the
    MXU; bias stays f32.
    """
    kw, kb = jax.random.split(key)
    bound = 1.0 / math.sqrt(in_features)
    w = jax.random.uniform(kw, (out_features, in_features), jnp.float32,
                           -bound, bound)
    b = jax.random.uniform(kb, (out_features,), jnp.float32, -bound, bound)
    return w.T.astype(w_dtype), b


class LinearEncoderPallas:
    """Pallas port of the PyTorch LinearEncoder.

    Layer stack (matches the spec exactly):
      flatten -> [Linear + sigmoid] for every consecutive pair in
      [H*W, *h_dims, encoding_dim] -> out_layer Linear(encoding_dim,
      encoding_dim) with no sigmoid.
    """

    def __init__(self, input_dims, encoding_dim, h_dims, key,
                 w_dtype=jnp.bfloat16):
        dims = [input_dims[0] * input_dims[1], *h_dims, encoding_dim]
        layer_dims = list(zip(dims[:-1], dims[1:]))   # hidden (sigmoid) layers
        layer_dims.append((dims[-1], encoding_dim))   # out_layer (no sigmoid)
        keys = jax.random.split(key, len(layer_dims))

        self.encoding_dim = encoding_dim
        self.weights_t, self.biases = [], []          # true (unpadded) params
        for k, (d_in, d_out) in zip(keys, layer_dims):
            w_t, b = init_linear_params(k, d_in, d_out, w_dtype)
            self.weights_t.append(w_t)
            self.biases.append(b)

        # Lane-padded copies for the kernel: every out dim rounded up to a
        # multiple of 128 with zero weights/biases, so all matmul outputs and
        # the final HBM writeback are lane-dense.  Zero weight rows for the
        # padded input columns of the next layer make the padding exact.
        self._kernel_weights, self._kernel_biases = [], []
        pad_in = layer_dims[0][0]                     # flattened input dim
        for w_t, b in zip(self.weights_t, self.biases):
            d_in, d_out = w_t.shape
            pad_out = _round_up(d_out, LANE)
            w_pad = jnp.zeros((pad_in, pad_out), w_t.dtype)
            w_pad = w_pad.at[:d_in, :d_out].set(w_t)
            b_pad = jnp.zeros((1, pad_out), jnp.float32)
            b_pad = b_pad.at[0, :d_out].set(b)
            self._kernel_weights.append(w_pad)
            self._kernel_biases.append(b_pad)
            pad_in = pad_out

    def __call__(self, x):
        x = x.reshape(x.shape[0], -1)                 # torch .view(B, -1)
        return fused_encoder_forward(
            x, self._kernel_weights, self._kernel_biases, self.encoding_dim)


def reference_forward(model, x):
    """Pure-JAX reference (bf16 matmul operands, f32 accumulate/epilogue),
    using the true (unpadded) parameters — also validates that the lane
    padding inside the kernel is semantically transparent."""
    h = x.reshape(x.shape[0], -1).astype(jnp.float32)
    n = len(model.weights_t)
    for l, (w, b) in enumerate(zip(model.weights_t, model.biases)):
        h_bf = h.astype(jnp.bfloat16).astype(jnp.float32)
        h = jnp.dot(h_bf, w.astype(jnp.float32),
                    preferred_element_type=jnp.float32) + b
        if l < n - 1:
            h = jax.nn.sigmoid(h)
    return h


if __name__ == "__main__":
    key = jax.random.PRNGKey(0)
    k_x, k_x2, k_params = jax.random.split(key, 3)

    batch = 2
    input_dims = (16, 16)   # H, W -> flattened dim 256
    h_dims = [64, 32]
    encoding_dim = 8

    model = LinearEncoderPallas(input_dims, encoding_dim, h_dims, k_params)

    # 1) Tiny batch: padded up to one 8-row tile, single grid step.
    x = jax.random.normal(k_x, (batch, *input_dims), dtype=jnp.float32)
    out = jax.block_until_ready(model(x))
    ref = reference_forward(model, x)
    assert out.shape == (batch, encoding_dim), out.shape
    assert jnp.allclose(out, ref, atol=1e-2, rtol=1e-2), (
        "mismatch vs reference: max abs diff = %g"
        % float(jnp.max(jnp.abs(out - ref)))
    )

    # 2) Batched path: B=48 -> 2 tiles of 24 rows on a "parallel" grid axis.
    x_big = jax.random.normal(k_x2, (48, *input_dims), dtype=jnp.float32)
    out_big = jax.block_until_ready(model(x_big))
    ref_big = reference_forward(model, x_big)
    assert out_big.shape == (48, encoding_dim), out_big.shape
    assert jnp.allclose(out_big, ref_big, atol=1e-2, rtol=1e-2), (
        "batched mismatch vs reference: max abs diff = %g"
        % float(jnp.max(jnp.abs(out_big - ref_big)))
    )

    print("KERNEL_OK")
</pallas_src>

<mosaic_0001>
module attributes {stable_mosaic.version = 11 : i64} {
  func.func @_fused_mlp_kernel(%arg0: i32, %arg1: memref<8x256xf32, #tpu.memory_space<vmem>>, %arg2: memref<256x128xbf16, #tpu.memory_space<vmem>>, %arg3: memref<1x128xf32, #tpu.memory_space<vmem>>, %arg4: memref<128x128xbf16, #tpu.memory_space<vmem>>, %arg5: memref<1x128xf32, #tpu.memory_space<vmem>>, %arg6: memref<128x128xbf16, #tpu.memory_space<vmem>>, %arg7: memref<1x128xf32, #tpu.memory_space<vmem>>, %arg8: memref<128x128xbf16, #tpu.memory_space<vmem>>, %arg9: memref<1x128xf32, #tpu.memory_space<vmem>>, %arg10: memref<8x128xf32, #tpu.memory_space<vmem>>) attributes {dimension_semantics = [#tpu.dimension_semantics<parallel>], iteration_bounds = array<i64: 1>, scalar_prefetch = 0 : i64, scratch_operands = 0 : i64, tpu.core_type = #tpu.core_type<tc>, window_params = [{transform_indices = @transform_0, window_bounds = array<i64: 8, 256>}, {pipeline_mode = #tpu.pipeline_mode<synchronous>, transform_indices = @transform_1, window_bounds = array<i64: 256, 128>}, {pipeline_mode = #tpu.pipeline_mode<synchronous>, transform_indices = @transform_2, window_bounds = array<i64: 1, 128>}, {pipeline_mode = #tpu.pipeline_mode<synchronous>, transform_indices = @transform_3, window_bounds = array<i64: 128, 128>}, {pipeline_mode = #tpu.pipeline_mode<synchronous>, transform_indices = @transform_4, window_bounds = array<i64: 1, 128>}, {pipeline_mode = #tpu.pipeline_mode<synchronous>, transform_indices = @transform_5, window_bounds = array<i64: 128, 128>}, {pipeline_mode = #tpu.pipeline_mode<synchronous>, transform_indices = @transform_6, window_bounds = array<i64: 1, 128>}, {pipeline_mode = #tpu.pipeline_mode<synchronous>, transform_indices = @transform_7, window_bounds = array<i64: 128, 128>}, {pipeline_mode = #tpu.pipeline_mode<synchronous>, transform_indices = @transform_8, window_bounds = array<i64: 1, 128>}, {transform_indices = @transform_9, window_bounds = array<i64: 8, 128>}]} {
    %c0 = arith.constant 0 : index
    %c0_0 = arith.constant 0 : index
    %0 = vector.load %arg1[%c0, %c0_0] : memref<8x256xf32, #tpu.memory_space<vmem>>, vector<8x256xf32>
    %1 = arith.truncf %0 : vector<8x256xf32> to vector<8x256xbf16>
    %c0_1 = arith.constant 0 : index
    %c0_2 = arith.constant 0 : index
    %2 = vector.load %arg2[%c0_1, %c0_2] : memref<256x128xbf16, #tpu.memory_space<vmem>>, vector<256x128xbf16>
    %c0_3 = arith.constant 0 : index
    %c0_4 = arith.constant 0 : index
    %3 = vector.load %arg3[%c0_3, %c0_4] : memref<1x128xf32, #tpu.memory_space<vmem>>, vector<1x128xf32>
    %cst = arith.constant dense<0.000000e+00> : vector<8x128xf32>
    %4 = tpu.matmul %1, %2, %cst {dimension_numbers = #tpu.dot_dimension_numbers<[1], [0], [0], [1], [0, 0, 1, 1], [], []>} : vector<8x256xbf16>, vector<256x128xbf16>, vector<8x128xf32> -> vector<8x128xf32>
    %5 = vector.broadcast %3 : vector<1x128xf32> to vector<8x128xf32>
    %6 = arith.addf %4, %5 : vector<8x128xf32>
    %7 = arith.negf %6 : vector<8x128xf32>
    %8 = math.exp %7 : vector<8x128xf32>
    %cst_5 = arith.constant 1.000000e+00 : f32
    %9 = vector.broadcast %cst_5 : f32 to vector<8x128xf32>
    %10 = arith.addf %9, %8 : vector<8x128xf32>
    %11 = arith.divf %9, %10 : vector<8x128xf32>
    %12 = arith.truncf %11 : vector<8x128xf32> to vector<8x128xbf16>
    %c0_6 = arith.constant 0 : index
    %c0_7 = arith.constant 0 : index
    %13 = vector.load %arg4[%c0_6, %c0_7] : memref<128x128xbf16, #tpu.memory_space<vmem>>, vector<128x128xbf16>
    %c0_8 = arith.constant 0 : index
    %c0_9 = arith.constant 0 : index
    %14 = vector.load %arg5[%c0_8, %c0_9] : memref<1x128xf32, #tpu.memory_space<vmem>>, vector<1x128xf32>
    %cst_10 = arith.constant dense<0.000000e+00> : vector<8x128xf32>
    %15 = tpu.matmul %12, %13, %cst_10 {dimension_numbers = #tpu.dot_dimension_numbers<[1], [0], [0], [1], [0, 0, 1, 1], [], []>} : vector<8x128xbf16>, vector<128x128xbf16>, vector<8x128xf32> -> vector<8x128xf32>
    %16 = vector.broadcast %14 : vector<1x128xf32> to vector<8x128xf32>
    %17 = arith.addf %15, %16 : vector<8x128xf32>
    %18 = arith.negf %17 : vector<8x128xf32>
    %19 = math.exp %18 : vector<8x128xf32>
    %cst_11 = arith.constant 1.000000e+00 : f32
    %20 = vector.broadcast %cst_11 : f32 to vector<8x128xf32>
    %21 = arith.addf %20, %19 : vector<8x128xf32>
    %22 = arith.divf %20, %21 : vector<8x128xf32>
    %23 = arith.truncf %22 : vector<8x128xf32> to vector<8x128xbf16>
    %c0_12 = arith.constant 0 : index
    %c0_13 = arith.constant 0 : index
    %24 = vector.load %arg6[%c0_12, %c0_13] : memref<128x128xbf16, #tpu.memory_space<vmem>>, vector<128x128xbf16>
    %c0_14 = arith.constant 0 : index
    %c0_15 = arith.constant 0 : index
    %25 = vector.load %arg7[%c0_14, %c0_15] : memref<1x128xf32, #tpu.memory_space<vmem>>, vector<1x128xf32>
    %cst_16 = arith.constant dense<0.000000e+00> : vector<8x128xf32>
    %26 = tpu.matmul %23, %24, %cst_16 {dimension_numbers = #tpu.dot_dimension_numbers<[1], [0], [0], [1], [0, 0, 1, 1], [], []>} : vector<8x128xbf16>, vector<128x128xbf16>, vector<8x128xf32> -> vector<8x128xf32>
    %27 = vector.broadcast %25 : vector<1x128xf32> to vector<8x128xf32>
    %28 = arith.addf %26, %27 : vector<8x128xf32>
    %29 = arith.negf %28 : vector<8x128xf32>
    %30 = math.exp %29 : vector<8x128xf32>
    %cst_17 = arith.constant 1.000000e+00 : f32
    %31 = vector.broadcast %cst_17 : f32 to vector<8x128xf32>
    %32 = arith.addf %31, %30 : vector<8x128xf32>
    %33 = arith.divf %31, %32 : vector<8x128xf32>
    %34 = arith.truncf %33 : vector<8x128xf32> to vector<8x128xbf16>
    %c0_18 = arith.constant 0 : index
    %c0_19 = arith.constant 0 : index
    %35 = vector.load %arg8[%c0_18, %c0_19] : memref<128x128xbf16, #tpu.memory_space<vmem>>, vector<128x128xbf16>
    %c0_20 = arith.constant 0 : index
    %c0_21 = arith.constant 0 : index
    %36 = vector.load %arg9[%c0_20, %c0_21] : memref<1x128xf32, #tpu.memory_space<vmem>>, vector<1x128xf32>
    %cst_22 = arith.constant dense<0.000000e+00> : vector<8x128xf32>
    %37 = tpu.matmul %34, %35, %cst_22 {dimension_numbers = #tpu.dot_dimension_numbers<[1], [0], [0], [1], [0, 0, 1, 1], [], []>} : vector<8x128xbf16>, vector<128x128xbf16>, vector<8x128xf32> -> vector<8x128xf32>
    %38 = vector.broadcast %36 : vector<1x128xf32> to vector<8x128xf32>
    %39 = arith.addf %37, %38 : vector<8x128xf32>
    %c0_23 = arith.constant 0 : index
    %c0_24 = arith.constant 0 : index
    %40 = vector.load %arg10[%c0_23, %c0_24] : memref<8x128xf32, #tpu.memory_space<vmem>>, vector<8x128xf32>
    tpu.vector_store %arg10[%c0_23, %c0_24], %39 {strides = array<i32>} : memref<8x128xf32, #tpu.memory_space<vmem>>, vector<8x128xf32>,
    return
  }
  func.func @transform_0(%arg0: i32) -> (i32, i32) {
    %c0_i32 = arith.constant 0 : i32
    %c0_i32_0 = arith.constant 0 : i32
    return %arg0, %c0_i32 : i32, i32
  }
  func.func @transform_1(%arg0: i32) -> (i32, i32) {
    %c0_i32 = arith.constant 0 : i32
    %c0_i32_0 = arith.constant 0 : i32
    %c0_i32_1 = arith.constant 0 : i32
    return %c0_i32, %c0_i32_0 : i32, i32
  }
  func.func @transform_2(%arg0: i32) -> (i32, i32) {
    %c0_i32 = arith.constant 0 : i32
    %c0_i32_0 = arith.constant 0 : i32
    %c0_i32_1 = arith.constant 0 : i32
    return %c0_i32, %c0_i32_0 : i32, i32
  }
  func.func @transform_3(%arg0: i32) -> (i32, i32) {
    %c0_i32 = arith.constant 0 : i32
    %c0_i32_0 = arith.constant 0 : i32
    %c0_i32_1 = arith.constant 0 : i32
    return %c0_i32, %c0_i32_0 : i32, i32
  }
  func.func @transform_4(%arg0: i32) -> (i32, i32) {
    %c0_i32 = arith.constant 0 : i32
    %c0_i32_0 = arith.constant 0 : i32
    %c0_i32_1 = arith.constant 0 : i32
    return %c0_i32, %c0_i32_0 : i32, i32
  }
  func.func @transform_5(%arg0: i32) -> (i32, i32) {
    %c0_i32 = arith.constant 0 : i32
    %c0_i32_0 = arith.constant 0 : i32
    %c0_i32_1 = arith.constant 0 : i32
    return %c0_i32, %c0_i32_0 : i32, i32
  }
  func.func @transform_6(%arg0: i32) -> (i32, i32) {
    %c0_i32 = arith.constant 0 : i32
    %c0_i32_0 = arith.constant 0 : i32
    %c0_i32_1 = arith.constant 0 : i32
    return %c0_i32, %c0_i32_0 : i32, i32
  }
  func.func @transform_7(%arg0: i32) -> (i32, i32) {
    %c0_i32 = arith.constant 0 : i32
    %c0_i32_0 = arith.constant 0 : i32
    %c0_i32_1 = arith.constant 0 : i32
    return %c0_i32, %c0_i32_0 : i32, i32
  }
  func.func @transform_8(%arg0: i32) -> (i32, i32) {
    %c0_i32 = arith.constant 0 : i32
    %c0_i32_0 = arith.constant 0 : i32
    %c0_i32_1 = arith.constant 0 : i32
    return %c0_i32, %c0_i32_0 : i32, i32
  }
  func.func @transform_9(%arg0: i32) -> (i32, i32) {
    %c0_i32 = arith.constant 0 : i32
    %c0_i32_0 = arith.constant 0 : i32
    return %arg0, %c0_i32 : i32, i32
  }
}

</mosaic_0001>

<bundles_post_ra>
// kernel: tpu_custom_call.1
= control target key start
LH: loop header
LB: loop body
LE: loop exit
PB: predicated region body
PF: predicated region fallthrough
CT: control target
= control target key end

     0   :  { %14 = vsyncpa [#allocation3], 0  ;;  %s1195_s0 = inlined_call_operand.hbm [shape: f32[8,256], index: 0, kind: input, shape index: {}]   ;;  %s1196_s1 = inlined_call_operand.hbm [shape: bf16[256,128], index: 1, kind: input, shape index: {}]   ;;  %s1197_s2 = inlined_call_operand.vmem [shape: f32[1,128], index: 2, kind: input, shape index: {}]   ;;  %s1198_s3 = inlined_call_operand.hbm [shape: bf16[128,128], index: 3, kind: input, shape index: {}]   ;;  %s1199_s4 = inlined_call_operand.vmem [shape: f32[1,128], index: 4, kind: input, shape index: {}]   ;;  %s1200_s5 = inlined_call_operand.hbm [shape: bf16[128,128], index: 5, kind: input, shape index: {}]   ;;  %s1201_s6 = inlined_call_operand.vmem [shape: f32[1,128], index: 6, kind: input, shape index: {}]   ;;  %s1202_s7 = inlined_call_operand.hbm [shape: bf16[128,128], index: 7, kind: input, shape index: {}]   ;;  %s1203_s8 = inlined_call_operand.vmem [shape: f32[1,128], index: 8, kind: input, shape index: {}]   ;;  %s1204_s9 = inlined_call_operand.hbm [shape: f32[8,128], index: 9, kind: output, shape index: {}]  }
   0x1   :  { %15 = vsyncpa [#allocation6], 0 }
   0x2   :  { %16 = vsyncpa [#allocation9], 0 }
   0x3   :  { %17 = vsyncpa [#allocation4], 0  ;;  %s1009_s30 = smov [#allocation5]   ;;  %s869_s13 = scalar_lea.hbm %s1196_s1, 2048 }
   0x4   :  { %s33_s10 = sshll.u32 %s1009_s30, 4  ;;  %p870_p0 = scmp.ne.s32.totalorder %s1196_s1, %s869_s13  ;;  %s34_s10 = int_to_ptr.vmem [resolvable:$true] %s33_s10 }
   0x5   :  { %p873_p1 = scmp.lt.u32.totalorder %s869_s13, %s1196_s1 }
   0x7   :  { %p875_p2 = pnand %p873_p1, %p870_p0 }
   0x9   :  { %878 = shalt.err (!%p875_p2)
}
   0xa   :  { %s879_s18 = scalar_lea.vmem %s34_s10, 2048  ;;  %p884_p4 = scmp.lt.s32.totalorder %s34_s10, %s34_s10 }
   0xb   :  { %p880_p3 = scmp.ne.s32.totalorder %s34_s10, %s879_s18  ;;  %p885_p5 = scmp.lt.s32.totalorder %s879_s18, %s879_s18 }
   0xd   :  { %p886_p6 = por %p885_p5, %p884_p4 }
   0xf   :  { %p887_p7 = pnand %p886_p6, %p880_p3 }
  0x11   :  { %890 = shalt.err (!%p887_p7)
}
  0x12   :  { %s1010_s19 = smov 64   ;;  %s1011_s20 = smov 4  }
  0x13   :  { %39 = dma.hbm_to_vmem [thread:$0]  %s1196_s1, 2048, %s34_s10, [#allocation6], %s1010_s19, %s1010_s19, %s1011_s20  }
  0x14   :  { %s1012_s23 = smov [#allocation8]   ;;  %s1013_s25 = smov [#allocation2]  }
  0x15   :  { %s61_s24 = sshll.u32 %s1012_s23, 4  ;;  %s24_s26 = sshll.u32 %s1013_s25, 4  ;;  %s62_s24 = int_to_ptr.vmem [resolvable:$true] %s61_s24  ;;  %s25_s26 = int_to_ptr.vmem [resolvable:$true] %s24_s26 }
  0x16   :  { %s891_s29 = scalar_lea.hbm %s1200_s5, 1024 }
  0x17   :  { %p892_p8 = scmp.ne.s32.totalorder %s1200_s5, %s891_s29  ;;  %p895_p9 = scmp.lt.u32.totalorder %s891_s29, %s1200_s5 }
  0x19   :  { %p897_p10 = pnand %p895_p9, %p892_p8 }
  0x1b   :  { %900 = shalt.err (!%p897_p10)
}
  0x1c   :  { %s901_s1 = scalar_lea.vmem %s62_s24, 1024  ;;  %p906_p12 = scmp.lt.s32.totalorder %s62_s24, %s62_s24 }
  0x1d   :  { %p902_p11 = scmp.ne.s32.totalorder %s62_s24, %s901_s1  ;;  %p907_p13 = scmp.lt.s32.totalorder %s901_s1, %s901_s1 }
  0x1f   :  { %p908_p0 = por %p907_p13, %p906_p12 }
  0x21   :  { %p909_p1 = pnand %p908_p0, %p902_p11 }
  0x23   :  { %912 = shalt.err (!%p909_p1)
}
  0x24   :  { %67 = dma.hbm_to_vmem [thread:$0]  %s1200_s5, 1024, %s62_s24, [#allocation9], %s1010_s19, %s1010_s19, %s1011_s20  }
  0x25   :  { %s913_s17 = scalar_lea.hbm %s1195_s0, 256 }
  0x26   :  { %p914_p2 = scmp.ne.s32.totalorder %s1195_s0, %s913_s17  ;;  %p917_p3 = scmp.lt.u32.totalorder %s913_s17, %s1195_s0 }
  0x28   :  { %p919_p4 = pnand %p917_p3, %p914_p2 }
  0x2a   :  { %922 = shalt.err (!%p919_p4)
}
  0x2b   :  { %s923_s25 = scalar_lea.vmem %s25_s26, 256  ;;  %p928_p6 = scmp.lt.s32.totalorder %s25_s26, %s25_s26 }
  0x2c   :  { %p924_p5 = scmp.ne.s32.totalorder %s25_s26, %s923_s25  ;;  %p929_p7 = scmp.lt.s32.totalorder %s923_s25, %s923_s25 }
  0x2e   :  { %p930_p8 = por %p929_p7, %p928_p6 }
  0x30   :  { %p931_p9 = pnand %p930_p8, %p924_p5 }
  0x32   :  { %934 = shalt.err (!%p931_p9)
}
  0x33   :  { %27 = dma.hbm_to_vmem [thread:$0]  %s1195_s0, 256, %s25_s26, [#allocation3]  }
  0x34   :  { %s1014_s27 = smov [#allocation7]   ;;  %s1015_s29 = smov [#allocation10]  }
  0x35   :  { %s47_s28 = sshll.u32 %s1014_s27, 4  ;;  %s75_s30 = sshll.u32 %s1015_s29, 4  ;;  %s48_s28 = int_to_ptr.vmem [resolvable:$true] %s47_s28  ;;  %s76_s30 = int_to_ptr.vmem [resolvable:$true] %s75_s30 }
  0x36   :  { %s935_s13 = scalar_lea.hbm %s1198_s3, 1024 }
  0x37   :  { %p936_p10 = scmp.ne.s32.totalorder %s1198_s3, %s935_s13  ;;  %p939_p11 = scmp.lt.u32.totalorder %s935_s13, %s1198_s3 }
  0x39   :  { %p941_p12 = pnand %p939_p11, %p936_p10 }
  0x3b   :  { %944 = shalt.err (!%p941_p12)
}
  0x3c   :  { %s945_s0 = scalar_lea.vmem %s48_s28, 1024  ;;  %p950_p0 = scmp.lt.s32.totalorder %s48_s28, %s48_s28 }
  0x3d   :  { %p946_p13 = scmp.ne.s32.totalorder %s48_s28, %s945_s0  ;;  %p951_p1 = scmp.lt.s32.totalorder %s945_s0, %s945_s0 }
  0x3f   :  { %p952_p2 = por %p951_p1, %p950_p0 }
  0x41   :  { %p953_p3 = pnand %p952_p2, %p946_p13 }
  0x43   :  { %956 = shalt.err (!%p953_p3)
}
  0x44   :  { %53 = dma.hbm_to_vmem [thread:$0]  %s1198_s3, 1024, %s48_s28, [#allocation6], %s1010_s19, %s1010_s19, %s1011_s20  }
  0x45   :  { %s957_s21 = scalar_lea.hbm %s1202_s7, 1024 }
  0x46   :  { %p958_p4 = scmp.ne.s32.totalorder %s1202_s7, %s957_s21  ;;  %p961_p5 = scmp.lt.u32.totalorder %s957_s21, %s1202_s7 }
  0x48   :  { %p963_p6 = pnand %p961_p5, %p958_p4 }
  0x4a   :  { %966 = shalt.err (!%p963_p6)
}
  0x4b   :  { %s967_s24 = scalar_lea.vmem %s76_s30, 1024  ;;  %p972_p8 = scmp.lt.s32.totalorder %s76_s30, %s76_s30 }
  0x4c   :  { %p968_p7 = scmp.ne.s32.totalorder %s76_s30, %s967_s24  ;;  %p973_p9 = scmp.lt.s32.totalorder %s967_s24, %s967_s24 }
  0x4e   :  { %p974_p10 = por %p973_p9, %p972_p8 }
  0x50   :  { %p975_p11 = pnand %p974_p10, %p968_p7 }
  0x52   :  { %978 = shalt.err (!%p975_p11)
}
  0x53   :  { %81 = dma.hbm_to_vmem [thread:$0]  %s1202_s7, 1024, %s76_s30, [#allocation9], %s1010_s19, %s1010_s19, %s1011_s20  }
  0x54   :  { %1001 = dma.done.wait [#allocation3], 256  }
  0x55   :  { %1002 = vsyncadd [#allocation3], 4294967040 }
  0x56   :  { %1003 = dma.done.wait [#allocation6], 3072  }
  0x57   :  { %1004 = vsyncadd [#allocation6], 4294964224 }
  0x58   :  { %1005 = dma.done.wait [#allocation9], 2048  }
  0x59   :  { %1006 = vsyncadd [#allocation9], 4294965248  ;;  %v817_v0 = vld [vmem:[#allocation5 + $0x40] sm:$0xff]   ;;  %v819_v2 = vld [vmem:[#allocation5 + $0x48] sm:$0xff]   ;;  %v1016_v21 = vmov 0.0   ;;  %vm1017_vm0 = vmmov 0  }
  0x5a   :  { %v818_v1 = vld [vmem:[#allocation5] sm:$0xff]   ;;  %698 = vmatprep.subr.bf16.mxu0 %v817_v0  ;;  %v820_v3 = vld [vmem:[#allocation5 + $0x8] sm:$0xff]   ;;  %v821_v4 = vld [vmem:[#allocation5 + $0x50] sm:$0xff]   ;;  %747 = vmatprep.subr.bf16.mxu1 %v1016_v21  ;;  %s1018_s11 = smov [#allocation11]  }
  0x5b   :  { %699 = vmatpush3.bf16.msra.mxu0 %v818_v1  ;;  %v822_v5 = vld [vmem:[#allocation5 + $0x10] sm:$0xff]   ;;  %v823_v6 = vld [vmem:[#allocation5 + $0x58] sm:$0xff]   ;;  %v825_v8 = vld [vmem:[#allocation5 + $0x60] sm:$0xff]   ;;  %763 = vmatprep.mubr.msk.bf16.mxu1 %vm1017_vm0, %v1016_v21  ;;  %s640_s12 = sshll.u32 %s1018_s11, 4  ;;  %s641_s12 = int_to_ptr.vmem [resolvable:$true] %s640_s12 }
  0x5c   :  { %700 = vmatprep.subr.bf16.mxu0 %v819_v2  ;;  %v824_v7 = vld [vmem:[#allocation5 + $0x18] sm:$0xff]   ;;  %v826_v9 = vld [vmem:[#allocation5 + $0x20] sm:$0xff]   ;;  %v827_v10 = vld [vmem:[#allocation5 + $0x68] sm:$0xff]   ;;  %p984_p13 = scmp.lt.s32.totalorder %s641_s12, %s641_s12 }
  0x5d   :  { %v101_v11 = vld [vmem:[#allocation2 + $0x8] sm:$0xff]  ;;  %v828_v12 = vld [vmem:[#allocation5 + $0x28] sm:$0xff]   ;;  %v829_v14 = vld [vmem:[#allocation5 + $0x70] sm:$0xff]  }
  0x5e   :  { %v103_v13 = vpack.c.bf16 %v101_v11, %v101_v11  ;;  %v830_v15 = vld [vmem:[#allocation5 + $0x30] sm:$0xff]   ;;  %v831_v16 = vld [vmem:[#allocation5 + $0x78] sm:$0xff]   ;;  %v833_v20 = vld [vmem:[#allocation7] sm:$0xff]  }
  0x5f   :  { %701 = vmatpush3.bf16.msra.mxu0 %v820_v3  ;;  %v832_v17 = vld [vmem:[#allocation5 + $0x38] sm:$0xff]   ;;  %v100_v18 = vld [vmem:[#allocation2] sm:$0xff]  ;;  %748 = vmatpush3.bf16.msra.mxu1 %v833_v20  ;;  %v834_v22 = vld [vmem:[#allocation7 + $0x8] sm:$0xff]  }
  0x60   :  { %702 = vmatprep.subr.bf16.mxu0 %v821_v4  ;;  %271 = vmatprep.mubr.bf16.mxu0 %v103_v13  ;;  %v102_v19 = vpack.c.bf16 %v100_v18, %v100_v18  ;;  %v835_v23 = vld [vmem:[#allocation7 + $0x10] sm:$0xff]   ;;  %v836_v24 = vld [vmem:[#allocation7 + $0x18] sm:$0xff]   ;;  %v837_v25 = vld [vmem:[#allocation7 + $0x20] sm:$0xff]  }
  0x61   :  { %749 = vmatprep.subr.bf16.mxu1 %v1016_v21  ;;  %v838_v26 = vld [vmem:[#allocation7 + $0x28] sm:$0xff]   ;;  %v839_v27 = vld [vmem:[#allocation7 + $0x30] sm:$0xff]   ;;  %v840_v28 = vld [vmem:[#allocation7 + $0x38] sm:$0xff]  }
  0x62   :  { %v651_v30 = vld [vmem:[%s1197_s2] ss:$0 sm:$0xff]  ;;  %v841_v41 = vld [vmem:[#allocation8] sm:$0xff]   ;;  %v842_v42 = vld [vmem:[#allocation8 + $0x8] sm:$0xff]  }
  0x63   :  { %703 = vmatpush3.bf16.msra.mxu0 %v822_v5  ;;  %750 = vmatpush3.bf16.msra.mxu1 %v834_v22  ;;  %v843_v43 = vld [vmem:[#allocation8 + $0x10] sm:$0xff]   ;;  %v844_v44 = vld [vmem:[#allocation8 + $0x18] sm:$0xff]   ;;  %v845_v45 = vld [vmem:[#allocation8 + $0x20] sm:$0xff]  }
  0x64   :  { %704 = vmatprep.subr.bf16.mxu0 %v823_v6  ;;  %751 = vmatprep.subr.bf16.mxu1 %v1016_v21  ;;  %v846_v46 = vld [vmem:[#allocation8 + $0x28] sm:$0xff]   ;;  %v847_v47 = vld [vmem:[#allocation8 + $0x30] sm:$0xff]   ;;  %v848_v48 = vld [vmem:[#allocation8 + $0x38] sm:$0xff]  }
  0x65   :  { %v669_v49 = vld [vmem:[%s1199_s4] ss:$0 sm:$0xff]  ;;  %v849_v60 = vld [vmem:[#allocation10] sm:$0xff]   ;;  %v850_v61 = vld [vmem:[#allocation10 + $0x8] sm:$0xff]  }
  0x66   :  { %v851_v62 = vld [vmem:[#allocation10 + $0x10] sm:$0xff]   ;;  %v852_v63 = vld [vmem:[#allocation10 + $0x18] sm:$0xff]   ;;  %v853_v0 = vld [vmem:[#allocation10 + $0x20] sm:$0xff]  }
  0x67   :  { %705 = vmatpush3.bf16.msra.mxu0 %v824_v7  ;;  %752 = vmatpush3.bf16.msra.mxu1 %v835_v23  ;;  %v854_v1 = vld [vmem:[#allocation10 + $0x28] sm:$0xff]   ;;  %v855_v2 = vld [vmem:[#allocation10 + $0x30] sm:$0xff]   ;;  %v856_v3 = vld [vmem:[#allocation10 + $0x38] sm:$0xff]  }
  0x68   :  { %706 = vmatprep.subr.bf16.mxu0 %v825_v8  ;;  %753 = vmatprep.subr.bf16.mxu1 %v1016_v21  ;;  %v679_v4 = vld [vmem:[%s1201_s6] ss:$0 sm:$0xff]  ;;  %s979_s6 = scalar_lea.vmem %s641_s12, 128 }
  0x69   :  { %p980_p12 = scmp.ne.s32.totalorder %s641_s12, %s979_s6  ;;  %p985_p0 = scmp.lt.s32.totalorder %s979_s6, %s979_s6 }
  0x6b   :  { %707 = vmatpush3.bf16.msra.mxu0 %v826_v9  ;;  %754 = vmatpush3.bf16.msra.mxu1 %v836_v24  ;;  %p986_p1 = por %p985_p0, %p984_p13 }
  0x6c   :  { %708 = vmatprep.subr.bf16.mxu0 %v827_v10  ;;  %755 = vmatprep.subr.bf16.mxu1 %v1016_v21 }
  0x6d   :  { %p987_p2 = pnand %p986_p1, %p980_p12 }
  0x6f   :  { %709 = vmatpush3.bf16.msra.mxu0 %v828_v12  ;;  %756 = vmatpush3.bf16.msra.mxu1 %v837_v25 }
  0x70   :  { %710 = vmatprep.subr.bf16.mxu0 %v829_v14  ;;  %757 = vmatprep.subr.bf16.mxu1 %v1016_v21 }
  0x73   :  { %711 = vmatpush3.bf16.msra.mxu0 %v830_v15  ;;  %758 = vmatpush3.bf16.msra.mxu1 %v838_v26  ;;  %v689_v15 = vld [vmem:[%s1203_s8] ss:$0 sm:$0xff] }
  0x74   :  { %712 = vmatprep.subr.bf16.mxu0 %v831_v16  ;;  %759 = vmatprep.subr.bf16.mxu1 %v1016_v21 }
  0x77   :  { %713 = vmatpush3.bf16.msra.mxu0 %v832_v17  ;;  %760 = vmatpush3.bf16.msra.mxu1 %v839_v27 }
  0x78   :  { %767 = vmatprep.subr.bf16.mxu0 %v1016_v21  ;;  %761 = vmatprep.subr.bf16.mxu1 %v1016_v21 }
  0x7a   :  { %272 = vmatmul.mubr.bf16.vlgmr.msra.gmra.mrb[0].mxu0 %v102_v19 }
  0x7b   :  { %783 = vmatprep.mubr.msk.bf16.mxu0 %vm1017_vm0, %v1016_v21  ;;  %762 = vmatpush3.bf16.msra.mxu1 %v840_v28 }
  0x7c   :  { %787 = vmatprep.subr.bf16.mxu1 %v1016_v21  ;;  %768 = vmatpush3.bf16.msra.mxu0 %v841_v41 }
  0x7d   :  { %769 = vmatprep.subr.bf16.mxu0 %v1016_v21 }
  0x80   :  { %770 = vmatpush3.bf16.msra.mxu0 %v842_v42 }
  0x81   :  { %771 = vmatprep.subr.bf16.mxu0 %v1016_v21 }
  0x84   :  { %772 = vmatpush3.bf16.msra.mxu0 %v843_v43 }
  0x85   :  { %773 = vmatprep.subr.bf16.mxu0 %v1016_v21 }
  0x88   :  { %774 = vmatpush3.bf16.msra.mxu0 %v844_v44 }
  0x89   :  { %775 = vmatprep.subr.bf16.mxu0 %v1016_v21 }
  0x8c   :  { %776 = vmatpush3.bf16.msra.mxu0 %v845_v45 }
  0x8d   :  { %777 = vmatprep.subr.bf16.mxu0 %v1016_v21 }
  0x90   :  { %778 = vmatpush3.bf16.msra.mxu0 %v846_v46 }
  0x91   :  { %779 = vmatprep.subr.bf16.mxu0 %v1016_v21 }
  0x94   :  { %780 = vmatpush3.bf16.msra.mxu0 %v847_v47 }
  0x95   :  { %781 = vmatprep.subr.bf16.mxu0 %v1016_v21 }
  0x98   :  { %782 = vmatpush3.bf16.msra.mxu0 %v848_v48 }
 0x14d   :  { %v714_v29 = vpop.f32.mrb[0].mxu0 }
 0x14e   :  { %v715_v31 = vpop.f32.mrb[1].mxu0 }
 0x14f   :  { %v716_v32 = vadd.f32 %v715_v31, %v714_v29  ;;  %v717_v33 = vpop.f32.mrb[2].mxu0 }
 0x150   :  { %v718_v34 = vpop.f32.mrb[3].mxu0 }
 0x151   :  { %v274_v35 = vadd.f32 %v716_v32, %v651_v30 }
 0x153   :  { %v668_v36 = vmul.f32 -1.442695, %v274_v35 }
 0x155   :  { %857 = vpow2.f32 %v668_v36 }
 0x15f   :  { %v858_v37 = vpop.eup %857 }
 0x160   :  { %v282_v38 = vadd.f32 1.0, %v858_v37 }
 0x162   :  { %859 = vrcp.f32 %v282_v38 }
 0x16c   :  { %v860_v39 = vpop.eup %859 }
 0x16d   :  { %v285_v40 = vpack.c.bf16 %v860_v39, %v860_v39 }
 0x16f   :  { %764 = vmatmul.mubr.bf16.vlgmr.msra.gmra.mrb[0].mxu1 %v285_v40 }
 0x170   :  { %803 = vmatprep.mubr.msk.bf16.mxu1 %vm1017_vm0, %v1016_v21  ;;  %788 = vmatpush3.bf16.msra.mxu1 %v849_v60 }
 0x171   :  { %789 = vmatprep.subr.bf16.mxu1 %v1016_v21 }
 0x174   :  { %790 = vmatpush3.bf16.msra.mxu1 %v850_v61 }
 0x175   :  { %791 = vmatprep.subr.bf16.mxu1 %v1016_v21 }
 0x178   :  { %792 = vmatpush3.bf16.msra.mxu1 %v851_v62 }
 0x179   :  { %793 = vmatprep.subr.bf16.mxu1 %v1016_v21 }
 0x17c   :  { %794 = vmatpush3.bf16.msra.mxu1 %v852_v63 }
 0x17d   :  { %795 = vmatprep.subr.bf16.mxu1 %v1016_v21 }
 0x180   :  { %796 = vmatpush3.bf16.msra.mxu1 %v853_v0 }
 0x181   :  { %797 = vmatprep.subr.bf16.mxu1 %v1016_v21 }
 0x184   :  { %798 = vmatpush3.bf16.msra.mxu1 %v854_v1 }
 0x185   :  { %799 = vmatprep.subr.bf16.mxu1 %v1016_v21 }
 0x188   :  { %800 = vmatpush3.bf16.msra.mxu1 %v855_v2 }
 0x189   :  { %801 = vmatprep.subr.bf16.mxu1 %v1016_v21 }
 0x18c   :  { %802 = vmatpush3.bf16.msra.mxu1 %v856_v3 }
 0x242   :  { %v391_v50 = vpop.f32.mrb[0].mxu1 }
 0x243   :  { %v392_v51 = vadd.f32 %v669_v49, %v391_v50  ;;  %v765_v52 = vpop.f32.mrb[1].mxu1 }
 0x244   :  { %v394_v53 = vpop.f32.mrb[2].mxu1 }
 0x245   :  { %v678_v54 = vmul.f32 -1.442695, %v392_v51  ;;  %v766_v55 = vpop.f32.mrb[3].mxu1 }
 0x247   :  { %861 = vpow2.f32 %v678_v54 }
 0x251   :  { %v862_v56 = vpop.eup %861 }
 0x252   :  { %v400_v57 = vadd.f32 1.0, %v862_v56 }
 0x254   :  { %863 = vrcp.f32 %v400_v57 }
 0x25e   :  { %v864_v58 = vpop.eup %863 }
 0x25f   :  { %v403_v59 = vpack.c.bf16 %v864_v58, %v864_v58 }
 0x261   :  { %784 = vmatmul.mubr.bf16.vlgmr.msra.gmra.mrb[4].mxu0 %v403_v59 }
 0x334   :  { %v509_v5 = vpop.f32.mrb[4].mxu0 }
 0x335   :  { %v510_v6 = vadd.f32 %v679_v4, %v509_v5  ;;  %v785_v7 = vpop.f32.mrb[5].mxu0 }
 0x336   :  { %v512_v8 = vpop.f32.mrb[6].mxu0 }
 0x337   :  { %v688_v9 = vmul.f32 -1.442695, %v510_v6  ;;  %v786_v10 = vpop.f32.mrb[7].mxu0 }
 0x339   :  { %865 = vpow2.f32 %v688_v9 }
 0x343   :  { %v866_v11 = vpop.eup %865 }
 0x344   :  { %v518_v12 = vadd.f32 1.0, %v866_v11 }
 0x346   :  { %867 = vrcp.f32 %v518_v12 }
 0x350   :  { %v868_v13 = vpop.eup %867 }
 0x351   :  { %v521_v14 = vpack.c.bf16 %v868_v13, %v868_v13 }
 0x353   :  { %804 = vmatmul.mubr.bf16.vlgmr.msra.gmra.mrb[4].mxu1 %v521_v14 }
 0x426   :  { %v627_v16 = vpop.f32.mrb[4].mxu1 }
 0x427   :  { %v628_v17 = vadd.f32 %v689_v15, %v627_v16  ;;  %v805_v18 = vpop.f32.mrb[5].mxu1 }
 0x428   :  { %v630_v19 = vpop.f32.mrb[6].mxu1 }
 0x429   :  { %633 = vst [vmem:[#allocation11] sm:$0xff] %v628_v17  ;;  %v806_v20 = vpop.f32.mrb[7].mxu1 }
 0x42a   :  { %990 = shalt.err (!%p987_p2)
}
 0x42b   :  { %s991_s8 = scalar_lea.hbm %s1204_s9, 128 }
 0x42c   :  { %p992_p3 = scmp.ne.s32.totalorder %s1204_s9, %s991_s8  ;;  %p995_p4 = scmp.lt.u32.totalorder %s991_s8, %s1204_s9 }
 0x42e   :  { %p997_p5 = pnand %p995_p4, %p992_p3 }
 0x430   :  { %1000 = shalt.err (!%p997_p5)
}
 0x431   :  { %643 = dma.vmem_to_hbm [thread:$0]  %s641_s12, 128, %s1204_s9, [#allocation4]  }
 0x432   :  { %1007 = dma.done.wait [#allocation4], 128  }
 0x433   :  { %1008 = vsyncadd [#allocation4], 4294967168 }
 0x434   :  { %647 = vsyncpa [#allocation3], 1 }
 0x435   :  { %648 = vsyncpa [#allocation6], 1 }
 0x436   :  { %649 = vsyncpa [#allocation9], 1 }
 0x437   :  { %650 = vsyncpa [#allocation4], 1 }

</bundles_post_ra>
